<compile_context>
chip_gen: v5e
topology: v5e:2x2
jax: 0.10.0
libtpu: 0.0.40
codegen_flags: <defaults>
</compile_context>

<pallas_src>
import functools

import jax
import jax.numpy as jnp
from jax.experimental import pallas as pl
from jax.experimental.pallas import tpu as pltpu


# ---------------------------------------------------------------------------
# Tiling / compiler-parameter helpers (generation aware)
# ---------------------------------------------------------------------------

def _vmem_capacity_bytes() -> int:
    try:
        return int(pltpu.get_tpu_info().vmem_capacity_bytes)
    except Exception:
        return 64 * 1024 * 1024  # conservative (v7x-sized) fallback


def _block_byte_budget() -> int:
    # ~4 MiB logits block on 128-MiB VMEM parts (v5e/v6e), ~2 MiB on 64-MiB v7x.
    cap = _vmem_capacity_bytes()
    return max(512 * 1024, min(4 * 1024 * 1024, cap // 32))


def _round_down(x: int, m: int) -> int:
    return max(m, (x // m) * m)


def _compiler_params(dim_sems, block_bytes: int) -> pltpu.CompilerParams:
    cap = _vmem_capacity_bytes()
    # Double-buffered inputs + outputs + headroom, kept well below physical VMEM.
    limit = int(min(cap * 3 // 4, max(32 * 1024 * 1024, 4 * block_bytes)))
    return pltpu.CompilerParams(dimension_semantics=dim_sems,
                                vmem_limit_bytes=limit)


# ---------------------------------------------------------------------------
# Kernel A: NCHW-native path.  Tile = (C, T): classes on sublanes, T spatial
# samples on lanes.  All reductions over the class axis are cross-sublane.
# ---------------------------------------------------------------------------

def _wce_nchw_kernel(x_ref, y_ref, w_ref, out_ref, *, hw: int):
    """x_ref: (1, C, T) logits; y_ref: (1, 1, T) int32 targets;
    w_ref: (C, 1) f32 class weights; out_ref: (1, 1, 1, 128) f32 partials."""
    s = pl.program_id(1)
    c, t = x_ref.shape[1], x_ref.shape[2]

    x = x_ref[0].astype(jnp.float32)            # (C, T)
    y = y_ref[0]                                 # (1, T) int32
    w = w_ref[...].astype(jnp.float32)           # (C, 1)

    # Mask spatial columns past the end of the (possibly ragged) spatial extent.
    col = jax.lax.broadcasted_iota(jnp.int32, (1, t), 1) + s * t
    valid = col < hw                             # (1, T)
    x = jnp.where(valid, x, 0.0)

    # Numerically-stable log-sum-exp over the class (sublane) axis.
    m = jnp.max(x, axis=0, keepdims=True)                              # (1, T)
    lse = jnp.log(jnp.sum(jnp.exp(x - m), axis=0, keepdims=True)) + m  # (1, T)

    # One-hot gather of target logit and target-class weight.
    cls = jax.lax.broadcasted_iota(jnp.int32, (c, t), 0)               # (C, T)
    onehot = (cls == y).astype(jnp.float32)                            # (C, T)
    x_t = jnp.sum(onehot * x, axis=0, keepdims=True)                   # (1, T)
    w_t = jnp.sum(onehot * w, axis=0, keepdims=True)                   # (1, T)
    w_t = w_t * valid.astype(jnp.float32)

    nll = w_t * (lse - x_t)                                            # (1, T)

    # Pack the two per-tile partial sums into one lane-dense (1, 128) row.
    lane = jax.lax.broadcasted_iota(jnp.int32, (1, 128), 1)
    packed = jnp.where(lane == 0, jnp.sum(nll),
                       jnp.where(lane == 1, jnp.sum(w_t), 0.0))
    out_ref[...] = packed.reshape(out_ref.shape)


def _wce_nchw(x, y, weights):
    n, c, h, w_sp = x.shape
    hw = h * w_sp
    x3 = x.reshape(n, c, hw)                     # free view (trailing-dim merge)
    y3 = y.astype(jnp.int32).reshape(n, 1, hw)   # free view
    w2 = weights.astype(jnp.float32).reshape(c, 1)

    isz = x.dtype.itemsize
    budget = _block_byte_budget()
    t = _round_down(budget // max(1, c * isz), 128)
    if hw >= 128:
        t = min(t, _round_down(hw, 128))
    else:
        t = 128
    g = pl.cdiv(hw, t)

    # TODO(synk): for vocab-scale C with 4-D inputs, tile the class axis with an
    # online-softmax reduction; this path keeps the full class axis resident per tile.
    block_bytes = c * t * isz + t * 4 + c * 4 + 128 * 4
    r = n * hw
    cost = pl.CostEstimate(flops=8 * r * c,
                           transcendentals=r * c + r,
                           bytes_accessed=r * c * isz + r * 4 + c * 4 + n * g * 512)

    parts = pl.pallas_call(
        functools.partial(_wce_nchw_kernel, hw=hw),
        out_shape=jax.ShapeDtypeStruct((n, g, 1, 128), jnp.float32),
        grid_spec=pltpu.PrefetchScalarGridSpec(
            num_scalar_prefetch=0,
            grid=(n, g),
            in_specs=[
                pl.BlockSpec((1, c, t), lambda i, j: (i, 0, j)),  # logits tile
                pl.BlockSpec((1, 1, t), lambda i, j: (i, 0, j)),  # targets tile
                pl.BlockSpec((c, 1), lambda i, j: (0, 0)),        # class weights
            ],
            out_specs=pl.BlockSpec((1, 1, 1, 128), lambda i, j: (i, j, 0, 0)),
        ),
        compiler_params=_compiler_params(("parallel", "parallel"), block_bytes),
        cost_estimate=cost,
    )(x3, y3, w2)

    lsum = jnp.sum(parts[:, :, 0, 0])
    wsum = jnp.sum(parts[:, :, 0, 1])
    return lsum / wsum   # 0/0 -> NaN matches PyTorch when all selected weights are zero


# ---------------------------------------------------------------------------
# Kernel B: plain (N, C) path.  Rows on sublanes, classes on lanes (best for large C).
# ---------------------------------------------------------------------------

def _wce_rows_kernel(x_ref, y_ref, w_ref, out_ref, *, n_rows: int):
    """x_ref: (TN, C) logits; y_ref: (TN, 1) int32; w_ref: (1, C) f32;
    out_ref: (1, 1, 128) f32 partials (lane0 = weighted NLL sum, lane1 = weight sum)."""
    i = pl.program_id(0)
    tn, c = x_ref.shape

    x = x_ref[...].astype(jnp.float32)           # (TN, C)
    y = y_ref[...]                                # (TN, 1)
    w = w_ref[...].astype(jnp.float32)            # (1, C)

    row = jax.lax.broadcasted_iota(jnp.int32, (tn, 1), 0) + i * tn
    valid = row < n_rows                          # (TN, 1)
    x = jnp.where(valid, x, 0.0)

    m = jnp.max(x, axis=-1, keepdims=True)                               # (TN, 1)
    lse = jnp.log(jnp.sum(jnp.exp(x - m), axis=-1, keepdims=True)) + m   # (TN, 1)

    cls = jax.lax.broadcasted_iota(jnp.int32, (tn, c), 1)                # (TN, C)
    onehot = (cls == y).astype(jnp.float32)
    x_t = jnp.sum(onehot * x, axis=-1, keepdims=True)                    # (TN, 1)
    w_t = jnp.sum(onehot * w, axis=-1, keepdims=True)                    # (TN, 1)
    w_t = w_t * valid.astype(jnp.float32)

    nll = w_t * (lse - x_t)                                              # (TN, 1)

    lane = jax.lax.broadcasted_iota(jnp.int32, (1, 128), 1)
    packed = jnp.where(lane == 0, jnp.sum(nll),
                       jnp.where(lane == 1, jnp.sum(w_t), 0.0))
    out_ref[...] = packed.reshape(out_ref.shape)


def _wce_2d(x, y, weights):
    n, c = x.shape
    y2 = y.astype(jnp.int32).reshape(n, 1)
    w2 = weights.astype(jnp.float32).reshape(1, c)

    isz = x.dtype.itemsize
    mult = 16 if isz < 4 else 8          # sublane tile multiple (16 for bf16 packing)
    budget = _block_byte_budget()
    tn = _round_down(budget // max(1, c * isz), mult)
    if n >= mult:
        tn = min(tn, _round_down(n, mult))
    else:
        tn = mult
    g = pl.cdiv(n, tn)

    block_bytes = tn * c * isz + tn * 4 + c * 4 + 128 * 4
    cost = pl.CostEstimate(flops=8 * n * c,
                           transcendentals=n * c + n,
                           bytes_accessed=n * c * isz + n * 4 + c * 4 + g * 512)

    parts = pl.pallas_call(
        functools.partial(_wce_rows_kernel, n_rows=n),
        out_shape=jax.ShapeDtypeStruct((g, 1, 128), jnp.float32),
        grid_spec=pltpu.PrefetchScalarGridSpec(
            num_scalar_prefetch=0,
            grid=(g,),
            in_specs=[
                pl.BlockSpec((tn, c), lambda i: (i, 0)),   # logits tile
                pl.BlockSpec((tn, 1), lambda i: (i, 0)),   # targets tile
                pl.BlockSpec((1, c), lambda i: (0, 0)),    # class weights
            ],
            out_specs=pl.BlockSpec((1, 1, 128), lambda i: (i, 0, 0)),
        ),
        compiler_params=_compiler_params(("parallel",), block_bytes),
        cost_estimate=cost,
    )(x, y2, w2)

    lsum = jnp.sum(parts[:, 0, 0])
    wsum = jnp.sum(parts[:, 0, 1])
    return lsum / wsum


# ---------------------------------------------------------------------------
# Public API
# ---------------------------------------------------------------------------

@jax.jit
def weighted_cross_entropy(x, y, weights):
    """x: (N, C) or (N, C, H, W) float logits; y: (N,) or (N, H, W) int targets;
    weights: (C,) per-class weights. Returns scalar float32 loss."""
    if x.ndim == 4:
        return _wce_nchw(x, y, weights)
    if x.ndim == 2:
        return _wce_2d(x, y, weights)
    raise ValueError("expected logits of shape (N, C) or (N, C, H, W)")


class WeightedCrossEntropy:
    """Forward-pass analogue of the PyTorch module."""

    def __init__(self, n_classes: int, weights=None):
        if weights is None:
            weights = [1.0] * n_classes
        elif len(weights) != n_classes:
            raise Exception('Weight length {} does not match with number of classes {}'
                            .format(len(weights), n_classes))
        self.weights = jnp.asarray(weights, dtype=jnp.float32)

    def __call__(self, X, Y):
        return weighted_cross_entropy(X, Y, self.weights)


def _reference_loss(x, y, weights):
    """Pure-JAX reference matching torch.nn.CrossEntropyLoss(weight=weights)."""
    if x.ndim == 4:
        n, c, h, w = x.shape
        x = jnp.transpose(x, (0, 2, 3, 1)).reshape(n * h * w, c)
        y = y.reshape(n * h * w)
    logp = jax.nn.log_softmax(x.astype(jnp.float32), axis=-1)
    nll = -jnp.take_along_axis(logp, y[:, None].astype(jnp.int32), axis=-1)[:, 0]
    wt = weights.astype(jnp.float32)[y]
    return jnp.sum(wt * nll) / jnp.sum(wt)


if __name__ == "__main__":
    key = jax.random.PRNGKey(0)
    k1, k2, k3, k4, k5, k6 = jax.random.split(key, 6)

    # Case 1: segmentation-style NCHW logits with non-uniform class weights.
    n_classes = 4
    class_weights = jnp.array([0.5, 1.0, 1.5, 2.0], dtype=jnp.float32)
    x4 = jax.random.normal(k1, (2, n_classes, 16, 16), dtype=jnp.float32)
    y4 = jax.random.randint(k2, (2, 16, 16), 0, n_classes, dtype=jnp.int32)
    loss4 = jax.block_until_ready(weighted_cross_entropy(x4, y4, class_weights))
    ref4 = _reference_loss(x4, y4, class_weights)
    assert jnp.allclose(loss4, ref4, rtol=1e-5, atol=1e-5), (loss4, ref4)

    # Case 2: ragged spatial extent (H*W not a multiple of 128) -> exercises masking.
    x4r = jax.random.normal(k3, (2, n_classes, 10, 13), dtype=jnp.float32)
    y4r = jax.random.randint(k4, (2, 10, 13), 0, n_classes, dtype=jnp.int32)
    loss4r = jax.block_until_ready(weighted_cross_entropy(x4r, y4r, class_weights))
    ref4r = _reference_loss(x4r, y4r, class_weights)
    assert jnp.allclose(loss4r, ref4r, rtol=1e-5, atol=1e-5), (loss4r, ref4r)

    # Case 3: plain (N, C) classification via the module-style wrapper (uniform weights).
    module = WeightedCrossEntropy(n_classes=32)
    x2 = jax.random.normal(k5, (64, 32), dtype=jnp.float32)
    y2 = jax.random.randint(k6, (64,), 0, 32, dtype=jnp.int32)
    loss2 = jax.block_until_ready(module(x2, y2))
    ref2 = _reference_loss(x2, y2, module.weights)
    assert jnp.allclose(loss2, ref2, rtol=1e-5, atol=1e-5), (loss2, ref2)

    print("KERNEL_OK")
</pallas_src>

<mosaic_0001>
module attributes {stable_mosaic.version = 11 : i64} {
  func.func @_wce_nchw_kernel(%arg0: i32, %arg1: i32, %arg2: memref<1x4x256xf32, #tpu.memory_space<vmem>>, %arg3: memref<1x1x256xi32, #tpu.memory_space<vmem>>, %arg4: memref<4x1xf32, #tpu.memory_space<vmem>>, %arg5: memref<1x1x1x128xf32, #tpu.memory_space<vmem>>) attributes {dimension_semantics = [#tpu.dimension_semantics<parallel>, #tpu.dimension_semantics<parallel>], iteration_bounds = array<i64: 2, 1>, scalar_prefetch = 0 : i64, scratch_operands = 0 : i64, tpu.core_type = #tpu.core_type<tc>, window_params = [{transform_indices = @transform_0, window_bounds = array<i64: 1, 4, 256>}, {transform_indices = @transform_1, window_bounds = array<i64: 1, 1, 256>}, {pipeline_mode = #tpu.pipeline_mode<synchronous>, transform_indices = @transform_2, window_bounds = array<i64: 4, 1>}, {transform_indices = @transform_3, window_bounds = array<i64: 1, 1, 1, 128>}]} {
    %c0 = arith.constant 0 : index
    %c0_0 = arith.constant 0 : index
    %c0_1 = arith.constant 0 : index
    %0 = vector.load %arg2[%c0, %c0_0, %c0_1] : memref<1x4x256xf32, #tpu.memory_space<vmem>>, vector<1x4x256xf32>
    %1 = vector.shape_cast %0 : vector<1x4x256xf32> to vector<4x256xf32>
    %c0_2 = arith.constant 0 : index
    %c0_3 = arith.constant 0 : index
    %c0_4 = arith.constant 0 : index
    %2 = vector.load %arg3[%c0_2, %c0_3, %c0_4] : memref<1x1x256xi32, #tpu.memory_space<vmem>>, vector<1x1x256xi32>
    %3 = vector.shape_cast %2 : vector<1x1x256xi32> to vector<1x256xi32>
    %c0_5 = arith.constant 0 : index
    %c0_6 = arith.constant 0 : index
    %4 = vector.load %arg4[%c0_5, %c0_6] : memref<4x1xf32, #tpu.memory_space<vmem>>, vector<4x1xf32>
    %5 = tpu.iota {dimensions = array<i32: 1>} : vector<1x256xi32>
    %c256_i32 = arith.constant 256 : i32
    %6 = arith.muli %arg1, %c256_i32 : i32
    %7 = vector.broadcast %6 : i32 to vector<1x256xi32>
    %8 = arith.addi %5, %7 : vector<1x256xi32>
    %c256_i32_7 = arith.constant 256 : i32
    %9 = vector.broadcast %c256_i32_7 : i32 to vector<1x256xi32>
    %10 = arith.cmpi slt, %8, %9 : vector<1x256xi32>
    %cst = arith.constant 0.000000e+00 : f32
    %11 = vector.shape_cast %10 : vector<1x256xi1> to vector<1x256xi1>
    %12 = vector.broadcast %11 : vector<1x256xi1> to vector<4x256xi1>
    %13 = vector.broadcast %cst : f32 to vector<4x256xf32>
    %14 = arith.select %12, %1, %13 : vector<4x256xi1>, vector<4x256xf32>
    %cst_8 = arith.constant dense<0xFF800000> : vector<256xf32>
    %15 = vector.multi_reduction <maximumf>, %14, %cst_8 [0] : vector<4x256xf32> to vector<256xf32>
    %16 = vector.shape_cast %15 : vector<256xf32> to vector<1x256xf32>
    %17 = vector.broadcast %16 : vector<1x256xf32> to vector<4x256xf32>
    %18 = arith.subf %14, %17 : vector<4x256xf32>
    %19 = math.exp %18 : vector<4x256xf32>
    %cst_9 = arith.constant dense<0.000000e+00> : vector<256xf32>
    %20 = vector.multi_reduction <add>, %19, %cst_9 [0] : vector<4x256xf32> to vector<256xf32>
    %21 = vector.shape_cast %20 : vector<256xf32> to vector<1x256xf32>
    %22 = math.log %21 : vector<1x256xf32>
    %23 = arith.addf %22, %16 : vector<1x256xf32>
    %24 = tpu.iota {dimensions = array<i32: 0>} : vector<4x256xi32>
    %25 = vector.broadcast %3 : vector<1x256xi32> to vector<4x256xi32>
    %26 = arith.cmpi eq, %24, %25 : vector<4x256xi32>
    %27 = arith.extui %26 : vector<4x256xi1> to vector<4x256xi32>
    %28 = arith.sitofp %27 : vector<4x256xi32> to vector<4x256xf32>
    %29 = arith.mulf %28, %14 : vector<4x256xf32>
    %cst_10 = arith.constant dense<0.000000e+00> : vector<256xf32>
    %30 = vector.multi_reduction <add>, %29, %cst_10 [0] : vector<4x256xf32> to vector<256xf32>
    %31 = vector.shape_cast %30 : vector<256xf32> to vector<1x256xf32>
    %32 = vector.broadcast %4 : vector<4x1xf32> to vector<4x256xf32>
    %33 = arith.mulf %28, %32 : vector<4x256xf32>
    %cst_11 = arith.constant dense<0.000000e+00> : vector<256xf32>
    %34 = vector.multi_reduction <add>, %33, %cst_11 [0] : vector<4x256xf32> to vector<256xf32>
    %35 = vector.shape_cast %34 : vector<256xf32> to vector<1x256xf32>
    %36 = arith.extui %10 : vector<1x256xi1> to vector<1x256xi32>
    %37 = arith.sitofp %36 : vector<1x256xi32> to vector<1x256xf32>
    %38 = arith.mulf %35, %37 : vector<1x256xf32>
    %39 = arith.subf %23, %31 : vector<1x256xf32>
    %40 = arith.mulf %38, %39 : vector<1x256xf32>
    %41 = tpu.iota {dimensions = array<i32: 1>} : vector<1x128xi32>
    %c0_i32 = arith.constant 0 : i32
    %42 = vector.broadcast %c0_i32 : i32 to vector<1x128xi32>
    %43 = arith.cmpi eq, %41, %42 : vector<1x128xi32>
    %44 = vector.shape_cast %40 : vector<1x256xf32> to vector<1x1x256xf32>
    %cst_12 = arith.constant dense<0.000000e+00> : vector<1xf32>
    %45 = vector.multi_reduction <add>, %44, %cst_12 [1, 2] : vector<1x1x256xf32> to vector<1xf32>
    %46 = vector.shape_cast %45 : vector<1xf32> to vector<1x1x1xf32>
    %47 = vector.extract %46[0, 0, 0] : f32 from vector<1x1x1xf32>
    %c1_i32 = arith.constant 1 : i32
    %48 = vector.broadcast %c1_i32 : i32 to vector<1x128xi32>
    %49 = arith.cmpi eq, %41, %48 : vector<1x128xi32>
    %50 = vector.shape_cast %38 : vector<1x256xf32> to vector<1x1x256xf32>
    %cst_13 = arith.constant dense<0.000000e+00> : vector<1xf32>
    %51 = vector.multi_reduction <add>, %50, %cst_13 [1, 2] : vector<1x1x256xf32> to vector<1xf32>
    %52 = vector.shape_cast %51 : vector<1xf32> to vector<1x1x1xf32>
    %53 = vector.extract %52[0, 0, 0] : f32 from vector<1x1x1xf32>
    %cst_14 = arith.constant 0.000000e+00 : f32
    %54 = vector.broadcast %53 : f32 to vector<1x128xf32>
    %55 = vector.broadcast %cst_14 : f32 to vector<1x128xf32>
    %56 = arith.select %49, %54, %55 : vector<1x128xi1>, vector<1x128xf32>
    %57 = vector.broadcast %47 : f32 to vector<1x128xf32>
    %58 = arith.select %43, %57, %56 : vector<1x128xi1>, vector<1x128xf32>
    %59 = vector.shape_cast %58 : vector<1x128xf32> to vector<1x1x1x128xf32>
    %c0_15 = arith.constant 0 : index
    %c0_16 = arith.constant 0 : index
    %c0_17 = arith.constant 0 : index
    %c0_18 = arith.constant 0 : index
    %60 = vector.load %arg5[%c0_15, %c0_16, %c0_17, %c0_18] : memref<1x1x1x128xf32, #tpu.memory_space<vmem>>, vector<1x1x1x128xf32>
    tpu.vector_store %arg5[%c0_15, %c0_16, %c0_17, %c0_18], %59 {strides = array<i32>} : memref<1x1x1x128xf32, #tpu.memory_space<vmem>>, vector<1x1x1x128xf32>,
    return
  }
  func.func @transform_0(%arg0: i32, %arg1: i32) -> (i32, i32, i32) {
    %c0_i32 = arith.constant 0 : i32
    %c0_i32_0 = arith.constant 0 : i32
    return %arg0, %c0_i32, %arg1 : i32, i32, i32
  }
  func.func @transform_1(%arg0: i32, %arg1: i32) -> (i32, i32, i32) {
    %c0_i32 = arith.constant 0 : i32
    %c0_i32_0 = arith.constant 0 : i32
    return %arg0, %c0_i32, %arg1 : i32, i32, i32
  }
  func.func @transform_2(%arg0: i32, %arg1: i32) -> (i32, i32) {
    %c0_i32 = arith.constant 0 : i32
    %c0_i32_0 = arith.constant 0 : i32
    %c0_i32_1 = arith.constant 0 : i32
    return %c0_i32, %c0_i32_0 : i32, i32
  }
  func.func @transform_3(%arg0: i32, %arg1: i32) -> (i32, i32, i32, i32) {
    %c0_i32 = arith.constant 0 : i32
    %c0_i32_0 = arith.constant 0 : i32
    %c0_i32_1 = arith.constant 0 : i32
    return %arg0, %arg1, %c0_i32, %c0_i32_0 : i32, i32, i32, i32
  }
}

</mosaic_0001>

<bundles_post_ra>
// kernel: weighted_cross_entropy.1
= control target key start
LH: loop header
LB: loop body
LE: loop exit
PB: predicated region body
PF: predicated region fallthrough
CT: control target
= control target key end

     0   :  { %s572_s12 = smov 0   ;;  %s574_s13 = smov 0   ;;  %s634_s0 = inlined_call_operand.vmem [shape: f32[2,4,256], index: 0, kind: input, shape index: {}]   ;;  %s635_s1 = inlined_call_operand.vmem [shape: s32[2,1,256], index: 1, kind: input, shape index: {}]   ;;  %s636_s2 = inlined_call_operand.vmem [shape: f32[4,1], index: 2, kind: input, shape index: {}]   ;;  %s637_s3 = inlined_call_operand.vmem [shape: f32[2,1,1,128], index: 3, kind: output, shape index: {}]  }
   0x1   :  { %s576_s14 = smov 0  }
   0x2 LB: > { %s25_s15 = sadd.s32 1, %s544_s13  ;;  %p478_p0 = scmp.ge.s32.totalorder %s548_s14, 1  ;;  %s548_s14 = sphi %s576_s14, %s13_s14   ;;  %s544_s13 = sphi %s574_s13, %s639_s13   ;;  %s540_s12 = sphi %s572_s12, %s638_s12  }
   0x3   : > { %p27_p1 = scmp.ge.s32.totalorder %s25_s15, 2  ;;  %p174_p2 = scmp.lt.s32.totalorder %s548_s14, 3 }
   0x5   : > { %s641_s15 = smov (%p27_p1, %s25_s15), 0  ;;  %p175_p3 = pnand %p478_p0, %p174_p2 }
   0x6   : > { %p212_p4 = scmp.lt.s32.totalorder (!%p175_p3), %s540_s12, 1 }
   0x7   : > { %178 = sbr.rel (%p175_p3) target bundleno = 332 (0x14c), region = 32 }
   0xc   : > { %v238_v0 = vld [vmem:[%s636_s2] sm:$0xf]  ;;  %v550_v1 = vmov 0   ;;  %s643_s12 = smov (!%p212_p4, %s540_s12), 1  ;;  %vm260_vm0 = vcmask 1043456   ;;  %v239_v25 = vlaneseq  ;;  %v551_v36 = vmov 0.0  }
   0xd   : > { %517 = vset.pattern.permute.xlu0 %v550_v1  ;;  %s486_s18 = sshll.u32 %s643_s12, 3  ;;  %s481_s22 = sshll.u32 %s643_s12, 1  ;;  %vm357_vm3 = vcmask 1040384  }
   0xe   : > { %329 = vperm.xlu0 %517, %v238_v0   ;;  %s219_s21 = scalar_lea.vmem %s634_s0, %s486_s18  ;;  %s228_s25 = scalar_lea.vmem %s635_s1, %s481_s22  ;;  %v302_v29 = vshrl.u32 %v239_v25, 7 }
   0xf   : > { %v236_v2 = vld [vmem:[%s219_s21] sm:$0xff]  ;;  %s235_s30 = scalar_lea.vmem %s637_s3, %s643_s12 }
  0x10   : > { %253 = vst [vmem:[#allocation1] ss:$2 sm:$0xff] %v236_v2  ;;  %v237_v26 = vld [vmem:[%s228_s25] sm:$0x3] }
  0x11   : > { %v303_v31 = vperm.slane %v237_v26, 0  ;;  %v304_v33 = vperm.slane %v237_v26, 1 }
  0x13   : > { %vm305_vm1 = vcmp.eq.s32.totalorder %v302_v29, %v303_v31  ;;  %vm306_vm2 = vcmp.eq.s32.totalorder %v302_v29, %v304_v33 }
  0x14   : > { %v482_v37 = vsel %vm305_vm1, 1.0, %v551_v36  ;;  %v483_v38 = vsel %vm306_vm2, 1.0, %v551_v36 }
  0x17   : > { %v254_v3 = vld.sshfl [vmem:[#allocation1] sm:$0xff pattern:$0x75316420]  ;;  %v255_v4 = vld.sshfl [vmem:[#allocation1 + $0x8] sm:$0xff pattern:$0x75316420] }
  0x18   : > { %v261_v5 = vsel %vm260_vm0, %v254_v3, -inf  ;;  %v268_v6 = vsel %vm260_vm0, %v255_v4, -inf  ;;  %v311_v41 = vmul.f32 %v482_v37, %v254_v3  ;;  %v312_v42 = vmul.f32 %v483_v38, %v255_v4 }
  0x19   : > { %v262_v7 = vrot.slane %v261_v5, 4  ;;  %v269_v8 = vrot.slane %v268_v6, 4 }
  0x1a   : > { %v313_v45 = vsel %vm260_vm0, %v311_v41, 0.0  ;;  %v320_v46 = vsel %vm260_vm0, %v312_v42, 0.0 }
  0x1b   : > { %v263_v9 = vmax.f32 %v261_v5, %v262_v7  ;;  %v270_v10 = vmax.f32 %v268_v6, %v269_v8  ;;  %v314_v48 = vrot.slane %v313_v45, 4  ;;  %v321_v50 = vrot.slane %v320_v46, 4 }
  0x1d   : > { %v264_v11 = vrot.slane %v263_v9, 2  ;;  %v271_v12 = vrot.slane %v270_v10, 2  ;;  %v315_v52 = vadd.f32 %v314_v48, %v313_v45  ;;  %v322_v54 = vadd.f32 %v321_v50, %v320_v46 }
  0x1f   : > { %v265_v13 = vmax.f32 %v263_v9, %v264_v11  ;;  %v272_v14 = vmax.f32 %v270_v10, %v271_v12  ;;  %v316_v55 = vrot.slane %v315_v52, 2  ;;  %v323_v56 = vrot.slane %v322_v54, 2 }
  0x21   : > { %v266_v15 = vrot.slane %v265_v13, 1  ;;  %v273_v16 = vrot.slane %v272_v14, 1  ;;  %v317_v57 = vadd.f32 %v316_v55, %v315_v52  ;;  %v324_v60 = vadd.f32 %v323_v56, %v322_v54 }
  0x23   : > { %v601_v17 = vmax.f32 %v265_v13, %v266_v15  ;;  %v603_v18 = vmax.f32 %v272_v14, %v273_v16  ;;  %v325_v7 = vrot.slane %v324_v60, 1 }
  0x25   : > { %v275_v19 = vsub.f32 %v254_v3, %v601_v17  ;;  %v276_v20 = vsub.f32 %v255_v4, %v603_v18  ;;  %v318_v3 = vrot.slane %v317_v57, 1  ;;  %v326_v15 = vadd.f32 %v325_v7, %v324_v60 }
  0x27   : > { %v277_v21 = vmul.f32 1.442695, %v275_v19  ;;  %v279_v22 = vmul.f32 1.442695, %v276_v20  ;;  %v319_v11 = vadd.f32 %v318_v3, %v317_v57 }
  0x29   : > { %518 = vpow2.f32 %v277_v21 }
  0x2a   : > { %520 = vpow2.f32 %v279_v22 }
  0x2f   : > { %v519_v23 = vpop.eup %518 }
  0x30   : > { %v521_v24 = vpop.eup %520  ;;  %v281_v27 = vsel %vm260_vm0, %v519_v23, 0.0 }
  0x31   : > { %v288_v28 = vsel %vm260_vm0, %v521_v24, 0.0  ;;  %v282_v30 = vrot.slane %v281_v27, 4 }
  0x32   : > { %v289_v32 = vrot.slane %v288_v28, 4 }
  0x33   : > { %v283_v34 = vadd.f32 %v282_v30, %v281_v27 }
  0x34   : > { %v290_v35 = vadd.f32 %v289_v32, %v288_v28 }
  0x35   : > { %v284_v39 = vrot.slane %v283_v34, 2 }
  0x36   : > { %v291_v40 = vrot.slane %v290_v35, 2 }
  0x37   : > { %v285_v43 = vadd.f32 %v284_v39, %v283_v34 }
  0x38   : > { %v292_v44 = vadd.f32 %v291_v40, %v290_v35 }
  0x39   : > { %v286_v47 = vrot.slane %v285_v43, 1 }
  0x3a   : > { %v293_v49 = vrot.slane %v292_v44, 1 }
  0x3b   : > { %v287_v51 = vadd.f32 %v286_v47, %v285_v43  ;;  %v240_v47 = vand.u32 127, %v239_v25 }
  0x3c   : > { %v294_v53 = vadd.f32 %v293_v49, %v292_v44 }
  0x3d   : > { %522 = vlog2.f32 %v287_v51  ;;  %vm370_vm4 = vcmp.eq.s32.totalorder %v240_v47, 1  ;;  %vm356_vm5 = vcmp.eq.s32.totalorder %v240_v47, 0 }
  0x3e   : > { %524 = vlog2.f32 %v294_v53 }
  0x43   : > { %v523_v58 = vpop.eup %522 }
  0x44   : > { %v525_v61 = vpop.eup %524  ;;  %v296_v2 = vmul.f32 0.6931472, %v523_v58 }
  0x45   : > { %v298_v6 = vmul.f32 0.6931472, %v525_v61 }
  0x46   : > { %v299_v10 = vadd.f32 %v296_v2, %v601_v17 }
  0x47   : > { %v300_v14 = vadd.f32 %v298_v6, %v603_v18 }
  0x48   : > { %v352_v22 = vsub.f32 %v299_v10, %v319_v11 }
  0x49   : > { %v353_v23 = vsub.f32 %v300_v14, %v326_v15 }
  0x80   : > { %v330_v59 = vpop.permute.xlu0 %329 }
  0x81   : > { %v332_v62 = vmul.f32 %v482_v37, %v330_v59  ;;  %v333_v63 = vmul.f32 %v483_v38, %v330_v59 }
  0x83   : > { %v334_v0 = vsel %vm260_vm0, %v332_v62, 0.0  ;;  %v341_v1 = vsel %vm260_vm0, %v333_v63, 0.0 }
  0x84   : > { %v335_v4 = vrot.slane %v334_v0, 4  ;;  %v342_v5 = vrot.slane %v341_v1, 4 }
  0x86   : > { %v336_v8 = vadd.f32 %v335_v4, %v334_v0  ;;  %v343_v9 = vadd.f32 %v342_v5, %v341_v1 }
  0x88   : > { %v337_v12 = vrot.slane %v336_v8, 2  ;;  %v344_v13 = vrot.slane %v343_v9, 2 }
  0x8a   : > { %v338_v16 = vadd.f32 %v337_v12, %v336_v8  ;;  %v345_v19 = vadd.f32 %v344_v13, %v343_v9 }
  0x8c   : > { %v339_v20 = vrot.slane %v338_v16, 1  ;;  %v346_v21 = vrot.slane %v345_v19, 1 }
  0x8e   : > { %v340_v24 = vadd.f32 %v339_v20, %v338_v16  ;;  %v347_v26 = vadd.f32 %v346_v21, %v345_v19 }
  0x90   : > { %v371_v27 = vsel %vm357_vm3, %v340_v24, 0.0  ;;  %v372_v28 = vsel %vm357_vm3, %v347_v26, 0.0  ;;  %v354_v29 = vmul.f32 %v352_v22, %v340_v24  ;;  %v355_v30 = vmul.f32 %v353_v23, %v347_v26 }
  0x91   : > { %v373_v17 = vadd.f32 %v372_v28, %v371_v27 }
  0x92   : > { %v358_v31 = vsel %vm357_vm3, %v354_v29, 0.0  ;;  %v359_v32 = vsel %vm357_vm3, %v355_v30, 0.0 }
  0x93   : > { %374 = vadd.xlane.f32.xlu1 %v373_v17  ;;  %v360_v33 = vadd.f32 %v359_v32, %v358_v31 }
  0x95   : > { %361 = vadd.xlane.f32.xlu0 %v360_v33 }
 0x106   : > { %v375_v18 = vpop.xlane.xlu1 %374 }
 0x107   : > { %v376_v34 = vrot.slane %v375_v18, 4 }
 0x108   : > { %v362_v35 = vpop.xlane.xlu0 %361 }
 0x109   : > { %v377_v36 = vadd.f32 %v376_v34, %v375_v18  ;;  %v363_v37 = vrot.slane %v362_v35, 4 }
 0x10b   : > { %v378_v38 = vrot.slane %v377_v36, 2  ;;  %v364_v39 = vadd.f32 %v363_v37, %v362_v35 }
 0x10d   : > { %v379_v40 = vadd.f32 %v378_v38, %v377_v36  ;;  %v365_v41 = vrot.slane %v364_v39, 2 }
 0x10f   : > { %v366_v42 = vadd.f32 %v365_v41, %v364_v39  ;;  %v380_v43 = vrot.slane %v379_v40, 1 }
 0x111   : > { %v367_v44 = vrot.slane %v366_v42, 1  ;;  %v381_v46 = vadd.f32 %v380_v43, %v379_v40 }
 0x113   : > { %v368_v45 = vadd.f32 %v367_v44, %v366_v42 }
 0x115   : > { %487 = vpush %v368_v45 }
 0x116   : > { %489 = vpush %v381_v46 }
 0x146   : > { %s488_s26 = spop %487 }
 0x147   : > { %v385_v48 = vstv %s488_s26  ;;  %s490_s27 = spop %489 }
 0x148   : > { %v383_v49 = vstv %s490_s27 }
 0x149   : > { %v384_v50 = vsel %vm370_vm4, %v383_v49, 0.0 }
 0x14a   : > { %v386_v51 = vsel %vm356_vm5, %v385_v48, %v384_v50 }
 0x14b   : > { %387 = vst [vmem:[%s235_s30] sm:$0x1] %v386_v51 }
 0x14c PF: > { %s13_s14 = sadd.s32 1, %s548_s14   ;;  %s638_s12 = smov %s544_s13 }
 0x14d   : > { %p10_p5 = scmp.ge.s32.totalorder %s13_s14, 4   ;;  %s639_s13 = smov %s641_s15 }
 0x14f   :  { %12 = sbr.rel (!%p10_p5) target bundleno = 2 (0x2), region = 65 }

</bundles_post_ra>
